<compile_context>
chip_gen: v5e
topology: v5e:2x2
jax: 0.10.0
libtpu: 0.0.40
codegen_flags: <defaults>
</compile_context>

<pallas_src>
import jax
import jax.numpy as jnp
from jax.experimental import pallas as pl
from jax.experimental.pallas import tpu as pltpu

C = 128          # fixed by feature_aggregation_layer's mlp: Conv1d(2*128 -> 128)
NEG_SLOPE = 0.2
BN_EPS = 1e-5


def _leaky(z):
    # LeakyReLU(0.2): max(z, 0.2*z) is exact for slope < 1.
    return jnp.maximum(z, NEG_SLOPE * z)


# ---------------------------------------------------------------------------
# Phase 1: edge features.
#   ef   = De^-1 @ (H^T @ x)                          (N is the reduction axis)
#   edge = leaky(bn(conv1x1(cat[y, ef])))  ==  leaky((y@Wa + ef@Wb)*s1 + sh1)
# ---------------------------------------------------------------------------
def _edge_kernel(ht_ref, x_ref, y_ref, de_ref, wa_ref, wb_ref, s1_ref, sh1_ref,
                 edge_ref, acc_ref):
    k = pl.program_id(2)

    @pl.when(k == 0)
    def _():
        acc_ref[...] = jnp.zeros_like(acc_ref)

    # acc += Ht_tile @ x_tile (contract the N tile; f32 accumulation on MXU).
    acc_ref[...] += jnp.einsum("ben,bnc->bec", ht_ref[...], x_ref[...],
                               preferred_element_type=jnp.float32)

    @pl.when(k == pl.num_programs(2) - 1)
    def _():
        Bt, Te, Cc = acc_ref.shape
        ef = acc_ref[...] * de_ref[...]                       # (Bt, Te, C) f32
        yv = y_ref[...].reshape(Bt * Te, Cc)
        efb = ef.reshape(Bt * Te, Cc).astype(yv.dtype)
        # Conv1d(2C->C, k=1) on cat([y, ef]) without the concat copy:
        # batch folded into the MXU M dimension.
        z = (jnp.dot(yv, wa_ref[...], preferred_element_type=jnp.float32)
             + jnp.dot(efb, wb_ref[...], preferred_element_type=jnp.float32))
        z = z * s1_ref[...] + sh1_ref[...]
        edge_ref[...] = _leaky(z).reshape(Bt, Te, Cc).astype(edge_ref.dtype)


# ---------------------------------------------------------------------------
# Phase 2: vertex features.
#   f2    = Dv^-1 @ (H @ (W_edge * edge))             (E is the reduction axis)
#   x_out = leaky(bn(conv1x1(f2)) + x)
# ---------------------------------------------------------------------------
def _vertex_kernel(ht_ref, edge_ref, we_ref, x_ref, dv_ref,
                   wcon_ref, s2_ref, sh2_ref, xo_ref, acc_ref):
    k = pl.program_id(2)

    @pl.when(k == 0)
    def _():
        acc_ref[...] = jnp.zeros_like(acc_ref)

    # W_edge applied on the VPU in f32; the SAME H^T tile is reused by
    # contracting its sublane E axis (transposed-LHS matmul) -> single H copy.
    we_edge = edge_ref[...].astype(jnp.float32) * we_ref[...]    # (Bt, Te, C)
    acc_ref[...] += jnp.einsum("ben,bec->bnc", ht_ref[...],
                               we_edge.astype(ht_ref.dtype),
                               preferred_element_type=jnp.float32)

    @pl.when(k == pl.num_programs(2) - 1)
    def _():
        Bt, Tn, Cc = acc_ref.shape
        f2 = acc_ref[...] * dv_ref[...]                          # (Bt, Tn, C) f32
        z2 = jnp.dot(f2.reshape(Bt * Tn, Cc).astype(wcon_ref.dtype),
                     wcon_ref[...], preferred_element_type=jnp.float32)
        z2 = z2 * s2_ref[...] + sh2_ref[...]
        out = z2.reshape(Bt, Tn, Cc) + x_ref[...].astype(jnp.float32)
        xo_ref[...] = _leaky(out).astype(xo_ref.dtype)


# ---------------------------------------------------------------------------
# Wrapper / tiling heuristics
# ---------------------------------------------------------------------------
def _nbytes(shape, dtype):
    n = 1
    for s in shape:
        n *= int(s)
    return n * jnp.dtype(dtype).itemsize


def _pick_tile(dim, cap, mult=16):
    """Largest divisor of `dim` <= cap, preferring multiples of `mult`
    (bf16 packs two rows per sublane)."""
    if dim <= cap:
        return dim
    best, best_m = 1, 0
    for d in range(1, min(dim, cap) + 1):
        if dim % d == 0:
            best = d
            if d % mult == 0:
                best_m = d
    return best_m if best_m else best


def hgnn_layer_forward(x, y, H, De_n_1, Dv_n_1, W_edge, params, *,
                       batch_tile=None, spatial_tile_cap=512):
    # W, alpha, thete, x0, k from the PyTorch signature are unused for this
    # configuration (aggr='mean', use_knn=False, residual_connection=False).
    bs, N, Cin = x.shape
    E = H.shape[2]
    assert Cin == C

    Tn = _pick_tile(N, spatial_tile_cap)
    Te = _pick_tile(E, spatial_tile_cap)

    # Per-batch per-step VMEM (double-buffered inputs/outputs + f32 accumulator).
    bf2, f4 = 2, 4
    per_b_p1 = (2 * (Te * Tn * bf2 + Tn * C * bf2 + Te * C * bf2 + Te * f4)
                + 2 * (Te * C * bf2) + Te * C * f4)
    per_b_p2 = (2 * (Te * Tn * bf2 + Te * C * bf2 + Te * f4
                     + Tn * C * bf2 + Tn * f4)
                + 2 * (Tn * C * bf2) + Tn * C * f4)
    per_b = max(per_b_p1, per_b_p2)
    budget = 32 * 1024 * 1024      # leaves headroom on v7x's 64 MiB VMEM

    if batch_tile is None:
        divs = [d for d in range(1, bs + 1) if bs % d == 0]
        fit = [d for d in divs if d * per_b <= budget] or [1]
        # Keep >= 2 batch grid steps so v7x's second TensorCore gets work
        # (the batch axis is the leading "parallel" axis).
        multi = [d for d in fit if bs // d >= 2]
        Bt = max(multi) if multi else max(fit)
    else:
        Bt = batch_tile
    assert bs % Bt == 0

    # TODO(synk): upstream should supply H already as (B, E, N) and the
    # inverse-degree *vectors*; the transpose / diagonal extraction below are
    # extra HBM round-trips outside the kernel.
    cdt = jnp.bfloat16
    x_b = x.astype(cdt)
    y_b = y.astype(cdt)
    Ht = jnp.swapaxes(H, 1, 2).astype(cdt)                            # (B, E, N)
    de_inv = jnp.diagonal(De_n_1, axis1=1, axis2=2)[..., None].astype(jnp.float32)
    dv_inv = jnp.diagonal(Dv_n_1, axis1=1, axis2=2)[..., None].astype(jnp.float32)
    we = W_edge.astype(jnp.float32)                                   # (B, E, 1)

    wmlp = params["wmlp"].astype(cdt)                                 # (2C, C)
    wa, wb = wmlp[:C], wmlp[C:]                                       # y-half, ef-half
    wcon = params["wcon"].astype(cdt)                                 # (C, C)
    s1 = params["scale1"].astype(jnp.float32)
    # fold the conv bias into the BN shift: (z + b)*s + sh == z*s + (b*s + sh)
    sh1 = (params["bmlp"] * params["scale1"] + params["shift1"]).astype(jnp.float32)
    s2 = params["scale2"].astype(jnp.float32)
    sh2 = params["shift2"].astype(jnp.float32)

    w_bytes = 2 * (2 * _nbytes((C, C), cdt) + 2 * _nbytes((1, C), jnp.float32))

    # ------------------------- phase 1: edge features -----------------------
    p1_in = [((Bt, Te, Tn), cdt), ((Bt, Tn, C), cdt), ((Bt, Te, C), cdt),
             ((Bt, Te, 1), jnp.float32)]
    p1_bytes = (2 * sum(_nbytes(s, d) for s, d in p1_in)
                + 2 * _nbytes((Bt, Te, C), cdt)
                + _nbytes((Bt, Te, C), jnp.float32) + w_bytes)
    vmem1 = int(min(max(int(1.5 * p1_bytes), 32 << 20), 48 << 20))

    edge = pl.pallas_call(
        _edge_kernel,
        grid=(bs // Bt, E // Te, N // Tn),
        in_specs=[
            pl.BlockSpec((Bt, Te, Tn), lambda b, e, n: (b, e, n)),   # H^T
            pl.BlockSpec((Bt, Tn, C), lambda b, e, n: (b, n, 0)),    # x
            pl.BlockSpec((Bt, Te, C), lambda b, e, n: (b, e, 0)),    # y
            pl.BlockSpec((Bt, Te, 1), lambda b, e, n: (b, e, 0)),    # De^-1 diag
            pl.BlockSpec((C, C), lambda b, e, n: (0, 0)),            # Wa
            pl.BlockSpec((C, C), lambda b, e, n: (0, 0)),            # Wb
            pl.BlockSpec((1, C), lambda b, e, n: (0, 0)),            # scale1
            pl.BlockSpec((1, C), lambda b, e, n: (0, 0)),            # shift1
        ],
        out_specs=pl.BlockSpec((Bt, Te, C), lambda b, e, n: (b, e, 0)),
        out_shape=jax.ShapeDtypeStruct((bs, E, C), cdt),
        scratch_shapes=[pltpu.VMEM((Bt, Te, C), jnp.float32)],
        compiler_params=pltpu.CompilerParams(
            dimension_semantics=("parallel", "parallel", "arbitrary"),
            vmem_limit_bytes=vmem1),
    )(Ht, x_b, y_b, de_inv, wa, wb, s1, sh1)

    # ------------------------ phase 2: vertex features ----------------------
    p2_in = [((Bt, Te, Tn), cdt), ((Bt, Te, C), cdt), ((Bt, Te, 1), jnp.float32),
             ((Bt, Tn, C), cdt), ((Bt, Tn, 1), jnp.float32)]
    p2_bytes = (2 * sum(_nbytes(s, d) for s, d in p2_in)
                + 2 * _nbytes((Bt, Tn, C), cdt)
                + _nbytes((Bt, Tn, C), jnp.float32) + w_bytes)
    vmem2 = int(min(max(int(1.5 * p2_bytes), 32 << 20), 48 << 20))

    x_out = pl.pallas_call(
        _vertex_kernel,
        grid=(bs // Bt, N // Tn, E // Te),
        in_specs=[
            pl.BlockSpec((Bt, Te, Tn), lambda b, n, e: (b, e, n)),   # H^T (reused)
            pl.BlockSpec((Bt, Te, C), lambda b, n, e: (b, e, 0)),    # edge feats
            pl.BlockSpec((Bt, Te, 1), lambda b, n, e: (b, e, 0)),    # W_edge
            pl.BlockSpec((Bt, Tn, C), lambda b, n, e: (b, n, 0)),    # x (residual add)
            pl.BlockSpec((Bt, Tn, 1), lambda b, n, e: (b, n, 0)),    # Dv^-1 diag
            pl.BlockSpec((C, C), lambda b, n, e: (0, 0)),            # Wcon
            pl.BlockSpec((1, C), lambda b, n, e: (0, 0)),            # scale2
            pl.BlockSpec((1, C), lambda b, n, e: (0, 0)),            # shift2
        ],
        out_specs=pl.BlockSpec((Bt, Tn, C), lambda b, n, e: (b, n, 0)),
        out_shape=jax.ShapeDtypeStruct((bs, N, C), cdt),
        scratch_shapes=[pltpu.VMEM((Bt, Tn, C), jnp.float32)],
        compiler_params=pltpu.CompilerParams(
            dimension_semantics=("parallel", "parallel", "arbitrary"),
            vmem_limit_bytes=vmem2),
    )(Ht, edge, we, x_b, dv_inv, wcon, s2, sh2)

    # TODO(synk): optional int8 path for H (exact 0/1) + int8-quantized
    # activations on v5e/v6e if the surrounding model tolerates it.
    return x_out, edge


# ---------------------------------------------------------------------------
# Parameters (BN folded to scale/shift) and a pure-JAX f32 reference
# ---------------------------------------------------------------------------
def init_params(key):
    ks = jax.random.split(key, 12)
    f32 = jnp.float32
    # fg.mlp: Conv1d(2C, C, 1) + BN(C)
    wmlp_t = 0.08 * jax.random.normal(ks[0], (C, 2 * C), f32)   # torch (out, in)
    bmlp = 0.05 * jax.random.normal(ks[1], (C,), f32)
    g1 = 1.0 + 0.1 * jax.random.normal(ks[2], (C,), f32)
    b1 = 0.05 * jax.random.normal(ks[3], (C,), f32)
    m1 = 0.05 * jax.random.normal(ks[4], (C,), f32)
    v1 = jax.random.uniform(ks[5], (C,), f32, 0.5, 1.5)
    # HGNN_layer: Conv1d(C, C, 1, bias=False) + BN(C)
    wcon_t = 0.08 * jax.random.normal(ks[6], (C, C), f32)       # torch (out, in)
    g2 = 1.0 + 0.1 * jax.random.normal(ks[7], (C,), f32)
    b2 = 0.05 * jax.random.normal(ks[8], (C,), f32)
    m2 = 0.05 * jax.random.normal(ks[9], (C,), f32)
    v2 = jax.random.uniform(ks[10], (C,), f32, 0.5, 1.5)

    s1 = g1 / jnp.sqrt(v1 + BN_EPS)
    s2 = g2 / jnp.sqrt(v2 + BN_EPS)
    return {
        "wmlp": wmlp_t.T,                       # (2C, C), channel-last matmul
        "bmlp": bmlp.reshape(1, C),
        "scale1": s1.reshape(1, C),
        "shift1": (b1 - m1 * s1).reshape(1, C),
        "wcon": wcon_t.T,                       # (C, C)
        "scale2": s2.reshape(1, C),
        "shift2": (b2 - m2 * s2).reshape(1, C),
    }


def reference(x, y, H, De, Dv, We, p):
    hi = jax.lax.Precision.HIGHEST
    lk = lambda z: jnp.where(z >= 0, z, NEG_SLOPE * z)
    f = jnp.einsum("bne,bnc->bec", H, x, precision=hi)
    ef = jnp.einsum("bef,bfc->bec", De, f, precision=hi)
    cat = jnp.concatenate([y, ef], axis=-1)
    z = jnp.einsum("bek,kc->bec", cat, p["wmlp"], precision=hi) + p["bmlp"][None]
    z = z * p["scale1"][None] + p["shift1"][None]
    edge = lk(z)
    f2 = We * edge
    f2 = jnp.einsum("bne,bec->bnc", H, f2, precision=hi)
    f2 = jnp.einsum("bnm,bmc->bnc", Dv, f2, precision=hi)
    z2 = jnp.einsum("bnc,cd->bnd", f2, p["wcon"], precision=hi)
    z2 = z2 * p["scale2"][None] + p["shift2"][None]
    return lk(z2 + x), edge


if __name__ == "__main__":
    key = jax.random.PRNGKey(0)
    kx, ky, kh, kw, kp = jax.random.split(key, 5)

    bs, N, E = 2, 16, 8
    x = jax.random.normal(kx, (bs, N, C), jnp.float32)          # vertex features
    y = jax.random.normal(ky, (bs, E, C), jnp.float32)          # prev edge features
    Hmat = (jax.random.uniform(kh, (bs, N, E)) < 0.5).astype(jnp.float32)
    deg_e = Hmat.sum(axis=1)                                    # (bs, E)
    deg_v = Hmat.sum(axis=2)                                    # (bs, N)
    De_n_1 = jnp.eye(E, dtype=jnp.float32)[None] / (deg_e[:, :, None] + 1e-6)
    Dv_n_1 = jnp.eye(N, dtype=jnp.float32)[None] / (deg_v[:, :, None] + 1e-6)
    W_edge = jax.random.uniform(kw, (bs, E, 1), jnp.float32, 0.5, 1.5)

    params = init_params(kp)

    fwd = jax.jit(hgnn_layer_forward)
    x_out, y_out = fwd(x, y, Hmat, De_n_1, Dv_n_1, W_edge, params)
    jax.block_until_ready((x_out, y_out))

    x_ref, y_ref = reference(x, y, Hmat, De_n_1, Dv_n_1, W_edge, params)
    assert x_out.shape == (bs, N, C) and y_out.shape == (bs, E, C)
    # tolerance covers bf16 MXU operands + bf16 output storage (f32 accumulation).
    assert jnp.allclose(x_out.astype(jnp.float32), x_ref, rtol=3e-2, atol=3e-2)
    assert jnp.allclose(y_out.astype(jnp.float32), y_ref, rtol=3e-2, atol=3e-2)
    print("KERNEL_OK")
</pallas_src>

<mosaic_0001>
module attributes {stable_mosaic.version = 11 : i64} {
  func.func @_edge_kernel(%arg0: i32, %arg1: i32, %arg2: i32, %arg3: memref<1x8x16xbf16, #tpu.memory_space<vmem>>, %arg4: memref<1x16x128xbf16, #tpu.memory_space<vmem>>, %arg5: memref<1x8x128xbf16, #tpu.memory_space<vmem>>, %arg6: memref<1x8x1xf32, #tpu.memory_space<vmem>>, %arg7: memref<128x128xbf16, #tpu.memory_space<vmem>>, %arg8: memref<128x128xbf16, #tpu.memory_space<vmem>>, %arg9: memref<1x128xf32, #tpu.memory_space<vmem>>, %arg10: memref<1x128xf32, #tpu.memory_space<vmem>>, %arg11: memref<1x8x128xbf16, #tpu.memory_space<vmem>>, %arg12: memref<1x8x128xf32, #tpu.memory_space<vmem>>) attributes {dimension_semantics = [#tpu.dimension_semantics<parallel>, #tpu.dimension_semantics<parallel>, #tpu.dimension_semantics<arbitrary>], iteration_bounds = array<i64: 2, 1, 1>, scalar_prefetch = 0 : i64, scratch_operands = 1 : i64, tpu.core_type = #tpu.core_type<tc>, window_params = [{transform_indices = @transform_0, window_bounds = array<i64: 1, 8, 16>}, {transform_indices = @transform_1, window_bounds = array<i64: 1, 16, 128>}, {transform_indices = @transform_2, window_bounds = array<i64: 1, 8, 128>}, {transform_indices = @transform_3, window_bounds = array<i64: 1, 8, 1>}, {pipeline_mode = #tpu.pipeline_mode<synchronous>, transform_indices = @transform_4, window_bounds = array<i64: 128, 128>}, {pipeline_mode = #tpu.pipeline_mode<synchronous>, transform_indices = @transform_5, window_bounds = array<i64: 128, 128>}, {pipeline_mode = #tpu.pipeline_mode<synchronous>, transform_indices = @transform_6, window_bounds = array<i64: 1, 128>}, {pipeline_mode = #tpu.pipeline_mode<synchronous>, transform_indices = @transform_7, window_bounds = array<i64: 1, 128>}, {transform_indices = @transform_8, window_bounds = array<i64: 1, 8, 128>}]} {
    %c0_i32 = arith.constant 0 : i32
    %0 = arith.cmpi eq, %arg2, %c0_i32 : i32
    %1 = arith.extui %0 : i1 to i32
    %c0_i32_0 = arith.constant 0 : i32
    %2 = arith.cmpi ne, %1, %c0_i32_0 : i32
    scf.if %2 {
      %cst_14 = arith.constant 0.000000e+00 : f32
      %12 = vector.broadcast %cst_14 : f32 to vector<1x8x128xf32>
      %c0_15 = arith.constant 0 : index
      %c0_16 = arith.constant 0 : index
      %c0_17 = arith.constant 0 : index
      %13 = vector.load %arg12[%c0_15, %c0_16, %c0_17] : memref<1x8x128xf32, #tpu.memory_space<vmem>>, vector<1x8x128xf32>
      tpu.vector_store %arg12[%c0_15, %c0_16, %c0_17], %12 {strides = array<i32>} : memref<1x8x128xf32, #tpu.memory_space<vmem>>, vector<1x8x128xf32>,
    } else {
    }
    %c0 = arith.constant 0 : index
    %c0_1 = arith.constant 0 : index
    %c0_2 = arith.constant 0 : index
    %3 = vector.load %arg12[%c0, %c0_1, %c0_2] : memref<1x8x128xf32, #tpu.memory_space<vmem>>, vector<1x8x128xf32>
    %c0_3 = arith.constant 0 : index
    %c0_4 = arith.constant 0 : index
    %c0_5 = arith.constant 0 : index
    %4 = vector.load %arg3[%c0_3, %c0_4, %c0_5] : memref<1x8x16xbf16, #tpu.memory_space<vmem>>, vector<1x8x16xbf16>
    %c0_6 = arith.constant 0 : index
    %c0_7 = arith.constant 0 : index
    %c0_8 = arith.constant 0 : index
    %5 = vector.load %arg4[%c0_6, %c0_7, %c0_8] : memref<1x16x128xbf16, #tpu.memory_space<vmem>>, vector<1x16x128xbf16>
    "tpu.trace_start"() <{level = 10 : i32, message = "ben,bnc->bec"}> : () -> ()
    %cst = arith.constant dense<0.000000e+00> : vector<1x8x128xf32>
    %6 = tpu.matmul %4, %5, %cst {dimension_numbers = #tpu.dot_dimension_numbers<[2], [1], [1], [2], [0, 0, 0, 1, 1, 2], [0], [0]>} : vector<1x8x16xbf16>, vector<1x16x128xbf16>, vector<1x8x128xf32> -> vector<1x8x128xf32>
    "tpu.trace_stop"() : () -> ()
    %7 = arith.addf %3, %6 : vector<1x8x128xf32>
    %c0_9 = arith.constant 0 : index
    %c0_10 = arith.constant 0 : index
    %c0_11 = arith.constant 0 : index
    %8 = vector.load %arg12[%c0_9, %c0_10, %c0_11] : memref<1x8x128xf32, #tpu.memory_space<vmem>>, vector<1x8x128xf32>
    tpu.vector_store %arg12[%c0_9, %c0_10, %c0_11], %7 {strides = array<i32>} : memref<1x8x128xf32, #tpu.memory_space<vmem>>, vector<1x8x128xf32>,
    %c0_i32_12 = arith.constant 0 : i32
    %9 = arith.cmpi eq, %arg2, %c0_i32_12 : i32
    %10 = arith.extui %9 : i1 to i32
    %c0_i32_13 = arith.constant 0 : i32
    %11 = arith.cmpi ne, %10, %c0_i32_13 : i32
    scf.if %11 {
      %c0_14 = arith.constant 0 : index
      %c0_15 = arith.constant 0 : index
      %c0_16 = arith.constant 0 : index
      %12 = vector.load %arg12[%c0_14, %c0_15, %c0_16] : memref<1x8x128xf32, #tpu.memory_space<vmem>>, vector<1x8x128xf32>
      %c0_17 = arith.constant 0 : index
      %c0_18 = arith.constant 0 : index
      %c0_19 = arith.constant 0 : index
      %13 = vector.load %arg6[%c0_17, %c0_18, %c0_19] : memref<1x8x1xf32, #tpu.memory_space<vmem>>, vector<1x8x1xf32>
      %14 = vector.broadcast %13 : vector<1x8x1xf32> to vector<1x8x128xf32>
      %15 = arith.mulf %12, %14 : vector<1x8x128xf32>
      %c0_20 = arith.constant 0 : index
      %c0_21 = arith.constant 0 : index
      %c0_22 = arith.constant 0 : index
      %16 = vector.load %arg5[%c0_20, %c0_21, %c0_22] : memref<1x8x128xbf16, #tpu.memory_space<vmem>>, vector<1x8x128xbf16>
      %17 = vector.shape_cast %16 : vector<1x8x128xbf16> to vector<8x128xbf16>
      %18 = vector.shape_cast %15 : vector<1x8x128xf32> to vector<8x128xf32>
      %19 = arith.truncf %18 : vector<8x128xf32> to vector<8x128xbf16>
      %c0_23 = arith.constant 0 : index
      %c0_24 = arith.constant 0 : index
      %20 = vector.load %arg7[%c0_23, %c0_24] : memref<128x128xbf16, #tpu.memory_space<vmem>>, vector<128x128xbf16>
      %cst_25 = arith.constant dense<0.000000e+00> : vector<8x128xf32>
      %21 = tpu.matmul %17, %20, %cst_25 {dimension_numbers = #tpu.dot_dimension_numbers<[1], [0], [0], [1], [0, 0, 1, 1], [], []>} : vector<8x128xbf16>, vector<128x128xbf16>, vector<8x128xf32> -> vector<8x128xf32>
      %c0_26 = arith.constant 0 : index
      %c0_27 = arith.constant 0 : index
      %22 = vector.load %arg8[%c0_26, %c0_27] : memref<128x128xbf16, #tpu.memory_space<vmem>>, vector<128x128xbf16>
      %cst_28 = arith.constant dense<0.000000e+00> : vector<8x128xf32>
      %23 = tpu.matmul %19, %22, %cst_28 {dimension_numbers = #tpu.dot_dimension_numbers<[1], [0], [0], [1], [0, 0, 1, 1], [], []>} : vector<8x128xbf16>, vector<128x128xbf16>, vector<8x128xf32> -> vector<8x128xf32>
      %24 = arith.addf %21, %23 : vector<8x128xf32>
      %c0_29 = arith.constant 0 : index
      %c0_30 = arith.constant 0 : index
      %25 = vector.load %arg9[%c0_29, %c0_30] : memref<1x128xf32, #tpu.memory_space<vmem>>, vector<1x128xf32>
      %26 = vector.broadcast %25 : vector<1x128xf32> to vector<8x128xf32>
      %27 = arith.mulf %24, %26 : vector<8x128xf32>
      %c0_31 = arith.constant 0 : index
      %c0_32 = arith.constant 0 : index
      %28 = vector.load %arg10[%c0_31, %c0_32] : memref<1x128xf32, #tpu.memory_space<vmem>>, vector<1x128xf32>
      %29 = vector.broadcast %28 : vector<1x128xf32> to vector<8x128xf32>
      %30 = arith.addf %27, %29 : vector<8x128xf32>
      %cst_33 = arith.constant 2.000000e-01 : f32
      %31 = vector.broadcast %cst_33 : f32 to vector<8x128xf32>
      %32 = arith.mulf %31, %30 : vector<8x128xf32>
      %33 = arith.maximumf %30, %32 : vector<8x128xf32>
      %34 = vector.shape_cast %33 : vector<8x128xf32> to vector<1x8x128xf32>
      %35 = arith.truncf %34 : vector<1x8x128xf32> to vector<1x8x128xbf16>
      %c0_34 = arith.constant 0 : index
      %c0_35 = arith.constant 0 : index
      %c0_36 = arith.constant 0 : index
      %36 = vector.load %arg11[%c0_34, %c0_35, %c0_36] : memref<1x8x128xbf16, #tpu.memory_space<vmem>>, vector<1x8x128xbf16>
      tpu.vector_store %arg11[%c0_34, %c0_35, %c0_36], %35 {strides = array<i32>} : memref<1x8x128xbf16, #tpu.memory_space<vmem>>, vector<1x8x128xbf16>,
    } else {
    }
    return
  }
  func.func @transform_0(%arg0: i32, %arg1: i32, %arg2: i32) -> (i32, i32, i32) {
    %c0_i32 = arith.constant 0 : i32
    return %arg0, %arg1, %arg2 : i32, i32, i32
  }
  func.func @transform_1(%arg0: i32, %arg1: i32, %arg2: i32) -> (i32, i32, i32) {
    %c0_i32 = arith.constant 0 : i32
    %c0_i32_0 = arith.constant 0 : i32
    return %arg0, %arg2, %c0_i32 : i32, i32, i32
  }
  func.func @transform_2(%arg0: i32, %arg1: i32, %arg2: i32) -> (i32, i32, i32) {
    %c0_i32 = arith.constant 0 : i32
    %c0_i32_0 = arith.constant 0 : i32
    return %arg0, %arg1, %c0_i32 : i32, i32, i32
  }
  func.func @transform_3(%arg0: i32, %arg1: i32, %arg2: i32) -> (i32, i32, i32) {
    %c0_i32 = arith.constant 0 : i32
    %c0_i32_0 = arith.constant 0 : i32
    return %arg0, %arg1, %c0_i32 : i32, i32, i32
  }
  func.func @transform_4(%arg0: i32, %arg1: i32, %arg2: i32) -> (i32, i32) {
    %c0_i32 = arith.constant 0 : i32
    %c0_i32_0 = arith.constant 0 : i32
    %c0_i32_1 = arith.constant 0 : i32
    return %c0_i32, %c0_i32_0 : i32, i32
  }
  func.func @transform_5(%arg0: i32, %arg1: i32, %arg2: i32) -> (i32, i32) {
    %c0_i32 = arith.constant 0 : i32
    %c0_i32_0 = arith.constant 0 : i32
    %c0_i32_1 = arith.constant 0 : i32
    return %c0_i32, %c0_i32_0 : i32, i32
  }
  func.func @transform_6(%arg0: i32, %arg1: i32, %arg2: i32) -> (i32, i32) {
    %c0_i32 = arith.constant 0 : i32
    %c0_i32_0 = arith.constant 0 : i32
    %c0_i32_1 = arith.constant 0 : i32
    return %c0_i32, %c0_i32_0 : i32, i32
  }
  func.func @transform_7(%arg0: i32, %arg1: i32, %arg2: i32) -> (i32, i32) {
    %c0_i32 = arith.constant 0 : i32
    %c0_i32_0 = arith.constant 0 : i32
    %c0_i32_1 = arith.constant 0 : i32
    return %c0_i32, %c0_i32_0 : i32, i32
  }
  func.func @transform_8(%arg0: i32, %arg1: i32, %arg2: i32) -> (i32, i32, i32) {
    %c0_i32 = arith.constant 0 : i32
    %c0_i32_0 = arith.constant 0 : i32
    return %arg0, %arg1, %c0_i32 : i32, i32, i32
  }
}

module attributes {stable_mosaic.version = 11 : i64} {
  func.func @_vertex_kernel(%arg0: i32, %arg1: i32, %arg2: i32, %arg3: memref<1x8x16xbf16, #tpu.memory_space<vmem>>, %arg4: memref<1x8x128xbf16, #tpu.memory_space<vmem>>, %arg5: memref<1x8x1xf32, #tpu.memory_space<vmem>>, %arg6: memref<1x16x128xbf16, #tpu.memory_space<vmem>>, %arg7: memref<1x16x1xf32, #tpu.memory_space<vmem>>, %arg8: memref<128x128xbf16, #tpu.memory_space<vmem>>, %arg9: memref<1x128xf32, #tpu.memory_space<vmem>>, %arg10: memref<1x128xf32, #tpu.memory_space<vmem>>, %arg11: memref<1x16x128xbf16, #tpu.memory_space<vmem>>, %arg12: memref<1x16x128xf32, #tpu.memory_space<vmem>>) attributes {dimension_semantics = [#tpu.dimension_semantics<parallel>, #tpu.dimension_semantics<parallel>, #tpu.dimension_semantics<arbitrary>], iteration_bounds = array<i64: 2, 1, 1>, scalar_prefetch = 0 : i64, scratch_operands = 1 : i64, tpu.core_type = #tpu.core_type<tc>, window_params = [{transform_indices = @transform_0, window_bounds = array<i64: 1, 8, 16>}, {transform_indices = @transform_1, window_bounds = array<i64: 1, 8, 128>}, {transform_indices = @transform_2, window_bounds = array<i64: 1, 8, 1>}, {transform_indices = @transform_3, window_bounds = array<i64: 1, 16, 128>}, {transform_indices = @transform_4, window_bounds = array<i64: 1, 16, 1>}, {pipeline_mode = #tpu.pipeline_mode<synchronous>, transform_indices = @transform_5, window_bounds = array<i64: 128, 128>}, {pipeline_mode = #tpu.pipeline_mode<synchronous>, transform_indices = @transform_6, window_bounds = array<i64: 1, 128>}, {pipeline_mode = #tpu.pipeline_mode<synchronous>, transform_indices = @transform_7, window_bounds = array<i64: 1, 128>}, {transform_indices = @transform_8, window_bounds = array<i64: 1, 16, 128>}]} {
    %c0_i32 = arith.constant 0 : i32
    %0 = arith.cmpi eq, %arg2, %c0_i32 : i32
    %1 = arith.extui %0 : i1 to i32
    %c0_i32_0 = arith.constant 0 : i32
    %2 = arith.cmpi ne, %1, %c0_i32_0 : i32
    scf.if %2 {
      %cst_17 = arith.constant 0.000000e+00 : f32
      %17 = vector.broadcast %cst_17 : f32 to vector<1x16x128xf32>
      %c0_18 = arith.constant 0 : index
      %c0_19 = arith.constant 0 : index
      %c0_20 = arith.constant 0 : index
      %18 = vector.load %arg12[%c0_18, %c0_19, %c0_20] : memref<1x16x128xf32, #tpu.memory_space<vmem>>, vector<1x16x128xf32>
      tpu.vector_store %arg12[%c0_18, %c0_19, %c0_20], %17 {strides = array<i32>} : memref<1x16x128xf32, #tpu.memory_space<vmem>>, vector<1x16x128xf32>,
    } else {
    }
    %c0 = arith.constant 0 : index
    %c0_1 = arith.constant 0 : index
    %c0_2 = arith.constant 0 : index
    %3 = vector.load %arg4[%c0, %c0_1, %c0_2] : memref<1x8x128xbf16, #tpu.memory_space<vmem>>, vector<1x8x128xbf16>
    %4 = arith.extf %3 : vector<1x8x128xbf16> to vector<1x8x128xf32>
    %c0_3 = arith.constant 0 : index
    %c0_4 = arith.constant 0 : index
    %c0_5 = arith.constant 0 : index
    %5 = vector.load %arg5[%c0_3, %c0_4, %c0_5] : memref<1x8x1xf32, #tpu.memory_space<vmem>>, vector<1x8x1xf32>
    %6 = vector.broadcast %5 : vector<1x8x1xf32> to vector<1x8x128xf32>
    %7 = arith.mulf %4, %6 : vector<1x8x128xf32>
    %c0_6 = arith.constant 0 : index
    %c0_7 = arith.constant 0 : index
    %c0_8 = arith.constant 0 : index
    %8 = vector.load %arg12[%c0_6, %c0_7, %c0_8] : memref<1x16x128xf32, #tpu.memory_space<vmem>>, vector<1x16x128xf32>
    %c0_9 = arith.constant 0 : index
    %c0_10 = arith.constant 0 : index
    %c0_11 = arith.constant 0 : index
    %9 = vector.load %arg3[%c0_9, %c0_10, %c0_11] : memref<1x8x16xbf16, #tpu.memory_space<vmem>>, vector<1x8x16xbf16>
    %10 = arith.truncf %7 : vector<1x8x128xf32> to vector<1x8x128xbf16>
    "tpu.trace_start"() <{level = 10 : i32, message = "ben,bec->bnc"}> : () -> ()
    %cst = arith.constant dense<0.000000e+00> : vector<1x16x128xf32>
    %11 = tpu.matmul %9, %10, %cst {dimension_numbers = #tpu.dot_dimension_numbers<[1], [1], [2], [2], [0, 0, 0, 2, 1, 2], [0], [0]>} : vector<1x8x16xbf16>, vector<1x8x128xbf16>, vector<1x16x128xf32> -> vector<1x16x128xf32>
    "tpu.trace_stop"() : () -> ()
    %12 = arith.addf %8, %11 : vector<1x16x128xf32>
    %c0_12 = arith.constant 0 : index
    %c0_13 = arith.constant 0 : index
    %c0_14 = arith.constant 0 : index
    %13 = vector.load %arg12[%c0_12, %c0_13, %c0_14] : memref<1x16x128xf32, #tpu.memory_space<vmem>>, vector<1x16x128xf32>
    tpu.vector_store %arg12[%c0_12, %c0_13, %c0_14], %12 {strides = array<i32>} : memref<1x16x128xf32, #tpu.memory_space<vmem>>, vector<1x16x128xf32>,
    %c0_i32_15 = arith.constant 0 : i32
    %14 = arith.cmpi eq, %arg2, %c0_i32_15 : i32
    %15 = arith.extui %14 : i1 to i32
    %c0_i32_16 = arith.constant 0 : i32
    %16 = arith.cmpi ne, %15, %c0_i32_16 : i32
    scf.if %16 {
      %c0_17 = arith.constant 0 : index
      %c0_18 = arith.constant 0 : index
      %c0_19 = arith.constant 0 : index
      %17 = vector.load %arg12[%c0_17, %c0_18, %c0_19] : memref<1x16x128xf32, #tpu.memory_space<vmem>>, vector<1x16x128xf32>
      %c0_20 = arith.constant 0 : index
      %c0_21 = arith.constant 0 : index
      %c0_22 = arith.constant 0 : index
      %18 = vector.load %arg7[%c0_20, %c0_21, %c0_22] : memref<1x16x1xf32, #tpu.memory_space<vmem>>, vector<1x16x1xf32>
      %19 = vector.broadcast %18 : vector<1x16x1xf32> to vector<1x16x128xf32>
      %20 = arith.mulf %17, %19 : vector<1x16x128xf32>
      %21 = vector.shape_cast %20 : vector<1x16x128xf32> to vector<16x128xf32>
      %22 = arith.truncf %21 : vector<16x128xf32> to vector<16x128xbf16>
      %c0_23 = arith.constant 0 : index
      %c0_24 = arith.constant 0 : index
      %23 = vector.load %arg8[%c0_23, %c0_24] : memref<128x128xbf16, #tpu.memory_space<vmem>>, vector<128x128xbf16>
      %cst_25 = arith.constant dense<0.000000e+00> : vector<16x128xf32>
      %24 = tpu.matmul %22, %23, %cst_25 {dimension_numbers = #tpu.dot_dimension_numbers<[1], [0], [0], [1], [0, 0, 1, 1], [], []>} : vector<16x128xbf16>, vector<128x128xbf16>, vector<16x128xf32> -> vector<16x128xf32>
      %c0_26 = arith.constant 0 : index
      %c0_27 = arith.constant 0 : index
      %25 = vector.load %arg9[%c0_26, %c0_27] : memref<1x128xf32, #tpu.memory_space<vmem>>, vector<1x128xf32>
      %26 = vector.broadcast %25 : vector<1x128xf32> to vector<16x128xf32>
      %27 = arith.mulf %24, %26 : vector<16x128xf32>
      %c0_28 = arith.constant 0 : index
      %c0_29 = arith.constant 0 : index
      %28 = vector.load %arg10[%c0_28, %c0_29] : memref<1x128xf32, #tpu.memory_space<vmem>>, vector<1x128xf32>
      %29 = vector.broadcast %28 : vector<1x128xf32> to vector<16x128xf32>
      %30 = arith.addf %27, %29 : vector<16x128xf32>
      %31 = vector.shape_cast %30 : vector<16x128xf32> to vector<1x16x128xf32>
      %c0_30 = arith.constant 0 : index
      %c0_31 = arith.constant 0 : index
      %c0_32 = arith.constant 0 : index
      %32 = vector.load %arg6[%c0_30, %c0_31, %c0_32] : memref<1x16x128xbf16, #tpu.memory_space<vmem>>, vector<1x16x128xbf16>
      %33 = arith.extf %32 : vector<1x16x128xbf16> to vector<1x16x128xf32>
      %34 = arith.addf %31, %33 : vector<1x16x128xf32>
      %cst_33 = arith.constant 2.000000e-01 : f32
      %35 = vector.broadcast %cst_33 : f32 to vector<1x16x128xf32>
      %36 = arith.mulf %35, %34 : vector<1x16x128xf32>
      %37 = arith.maximumf %34, %36 : vector<1x16x128xf32>
      %38 = arith.truncf %37 : vector<1x16x128xf32> to vector<1x16x128xbf16>
      %c0_34 = arith.constant 0 : index
      %c0_35 = arith.constant 0 : index
      %c0_36 = arith.constant 0 : index
      %39 = vector.load %arg11[%c0_34, %c0_35, %c0_36] : memref<1x16x128xbf16, #tpu.memory_space<vmem>>, vector<1x16x128xbf16>
      tpu.vector_store %arg11[%c0_34, %c0_35, %c0_36], %38 {strides = array<i32>} : memref<1x16x128xbf16, #tpu.memory_space<vmem>>, vector<1x16x128xbf16>,
    } else {
    }
    return
  }
  func.func @transform_0(%arg0: i32, %arg1: i32, %arg2: i32) -> (i32, i32, i32) {
    %c0_i32 = arith.constant 0 : i32
    return %arg0, %arg2, %arg1 : i32, i32, i32
  }
  func.func @transform_1(%arg0: i32, %arg1: i32, %arg2: i32) -> (i32, i32, i32) {
    %c0_i32 = arith.constant 0 : i32
    %c0_i32_0 = arith.constant 0 : i32
    return %arg0, %arg2, %c0_i32 : i32, i32, i32
  }
  func.func @transform_2(%arg0: i32, %arg1: i32, %arg2: i32) -> (i32, i32, i32) {
    %c0_i32 = arith.constant 0 : i32
    %c0_i32_0 = arith.constant 0 : i32
    return %arg0, %arg2, %c0_i32 : i32, i32, i32
  }
  func.func @transform_3(%arg0: i32, %arg1: i32, %arg2: i32) -> (i32, i32, i32) {
    %c0_i32 = arith.constant 0 : i32
    %c0_i32_0 = arith.constant 0 : i32
    return %arg0, %arg1, %c0_i32 : i32, i32, i32
  }
  func.func @transform_4(%arg0: i32, %arg1: i32, %arg2: i32) -> (i32, i32, i32) {
    %c0_i32 = arith.constant 0 : i32
    %c0_i32_0 = arith.constant 0 : i32
    return %arg0, %arg1, %c0_i32 : i32, i32, i32
  }
  func.func @transform_5(%arg0: i32, %arg1: i32, %arg2: i32) -> (i32, i32) {
    %c0_i32 = arith.constant 0 : i32
    %c0_i32_0 = arith.constant 0 : i32
    %c0_i32_1 = arith.constant 0 : i32
    return %c0_i32, %c0_i32_0 : i32, i32
  }
  func.func @transform_6(%arg0: i32, %arg1: i32, %arg2: i32) -> (i32, i32) {
    %c0_i32 = arith.constant 0 : i32
    %c0_i32_0 = arith.constant 0 : i32
    %c0_i32_1 = arith.constant 0 : i32
    return %c0_i32, %c0_i32_0 : i32, i32
  }
  func.func @transform_7(%arg0: i32, %arg1: i32, %arg2: i32) -> (i32, i32) {
    %c0_i32 = arith.constant 0 : i32
    %c0_i32_0 = arith.constant 0 : i32
    %c0_i32_1 = arith.constant 0 : i32
    return %c0_i32, %c0_i32_0 : i32, i32
  }
  func.func @transform_8(%arg0: i32, %arg1: i32, %arg2: i32) -> (i32, i32, i32) {
    %c0_i32 = arith.constant 0 : i32
    %c0_i32_0 = arith.constant 0 : i32
    return %arg0, %arg1, %c0_i32 : i32, i32, i32
  }
}

</mosaic_0001>

<bundles_post_ra>
// kernel: hgnn_layer_forward.2
= control target key start
LH: loop header
LB: loop body
LE: loop exit
PB: predicated region body
PF: predicated region fallthrough
CT: control target
= control target key end

     0   :  { %s984_s27 = smov 0   ;;  %s986_s28 = smov 0   ;;  %s1085_s0 = inlined_call_operand.vmem [shape: bf16[2,8,16], index: 0, kind: input, shape index: {}]   ;;  %s1086_s1 = inlined_call_operand.vmem [shape: bf16[2,16,128], index: 1, kind: input, shape index: {}]   ;;  %s1087_s2 = inlined_call_operand.vmem [shape: bf16[2,8,128], index: 2, kind: input, shape index: {}]   ;;  %s1088_s3 = inlined_call_operand.vmem [shape: f32[2,8,1], index: 3, kind: input, shape index: {}]   ;;  %s1089_s4 = inlined_call_operand.vmem [shape: bf16[128,128], index: 4, kind: input, shape index: {}]   ;;  %s1090_s5 = inlined_call_operand.vmem [shape: bf16[128,128], index: 5, kind: input, shape index: {}]   ;;  %s1091_s6 = inlined_call_operand.vmem [shape: f32[1,128], index: 6, kind: input, shape index: {}]   ;;  %s1092_s7 = inlined_call_operand.vmem [shape: f32[1,128], index: 7, kind: input, shape index: {}]   ;;  %s1093_s8 = inlined_call_operand.vmem [shape: bf16[2,8,128], index: 8, kind: output, shape index: {}]  }
   0x1   :  { %s988_s29 = smov 0  }
   0x2 LB: > { %s37_s30 = sadd.s32 1, %s932_s28  ;;  %p790_p0 = scmp.ge.s32.totalorder %s936_s29, 1  ;;  %s936_s29 = sphi %s988_s29, %s18_s29   ;;  %s932_s28 = sphi %s986_s28, %s1095_s28   ;;  %s928_s27 = sphi %s984_s27, %s1094_s27  }
   0x3   : > { %p39_p1 = scmp.ge.s32.totalorder %s37_s30, 2  ;;  %p337_p2 = scmp.lt.s32.totalorder %s936_s29, 3 }
   0x5   : > { %s1097_s30 = smov (%p39_p1, %s37_s30), 0  ;;  %p338_p3 = pnand %p790_p0, %p337_p2 }
   0x6   : > { %p401_p4 = scmp.lt.s32.totalorder (!%p338_p3), %s928_s27, 1 }
   0x7   : > { %341 = sbr.rel (%p338_p3) target bundleno = 288 (0x120), region = 52 }
   0xc   : > { %v877_v0 = vld [vmem:[%s1089_s4 + $0x38] sm:$0xff]  ;;  %v938_v1 = vmov 0   ;;  %s1099_s27 = smov (!%p401_p4, %s928_s27), 1  ;;  %v876_v3 = vld [vmem:[%s1089_s4 + $0x30] sm:$0xff]  ;;  %v875_v6 = vld [vmem:[%s1089_s4 + $0x28] sm:$0xff]  ;;  %vm458_vm0 = vcmask 130048  }
   0xd   : > { %911 = vset.pattern.permute.xlu0 %v938_v1  ;;  %v885_v2 = vld [vmem:[%s1090_s5 + $0x38] sm:$0xff]  ;;  %631 = vmatpush.bf16.msra.mxu2 %v877_v0  ;;  %v884_v4 = vld [vmem:[%s1090_s5 + $0x30] sm:$0xff]  ;;  %s868_s17 = sshll.u32 %s1099_s27, 3  ;;  %s1014_s18 = sshll.u32 %s1099_s27, 2  ;;  %v883_v8 = vld [vmem:[%s1090_s5 + $0x28] sm:$0xff] }
   0xe   : > { %570 = vmatpush.bf16.msra.mxu1 %v885_v2  ;;  %s419_s21 = scalar_lea.vmem %s1086_s1, %s868_s17  ;;  %s410_s24 = scalar_lea.vmem %s1085_s0, %s1014_s18  ;;  %v874_v10 = vld [vmem:[%s1089_s4 + $0x20] sm:$0xff]  ;;  %v873_v12 = vld [vmem:[%s1089_s4 + $0x18] sm:$0xff]  ;;  %v872_v14 = vld [vmem:[%s1089_s4 + $0x10] sm:$0xff] }
   0xf   : > { %v869_v5 = vld [vmem:[%s419_s21] sm:$0xff]  ;;  %s434_s9 = scalar_lea.vmem %s1088_s3, %s868_s17  ;;  %v881_v13 = vld [vmem:[%s1090_s5 + $0x18] sm:$0xff]  ;;  %v880_v15 = vld [vmem:[%s1090_s5 + $0x10] sm:$0xff]  ;;  %s427_s15 = scalar_lea.vmem %s1087_s2, %s1014_s18 }
  0x10   : > { %v481_v7 = vld [vmem:[%s434_s9] sm:$0xff]  ;;  %469 = vmatpush.bf16.msra.mxu0 %v869_v5  ;;  %v871_v16 = vld [vmem:[%s1089_s4 + $0x8] sm:$0xff]  ;;  %s441_s25 = scalar_lea.vmem %s1093_s8, %s1014_s18 }
  0x11   : > { %632 = vmatpush.bf16.msra.mxu2 %v876_v3  ;;  %v449_v9 = vld [vmem:[%s410_s24] sm:$0xf]  ;;  %484 = vperm.xlu0 %911, %v481_v7   ;;  %v879_v17 = vld [vmem:[%s1090_s5 + $0x8] sm:$0xff] }
  0x12   : > { %571 = vmatpush.bf16.msra.mxu1 %v884_v4  ;;  %v882_v11 = vld [vmem:[%s1090_s5 + $0x20] sm:$0xff] }
  0x13   : > { %801 = vmatmul.msk.bf16.vlgmr.msra.gmra.mxu0 %vm458_vm0, %v449_v9  ;;  %v870_v18 = vld [vmem:[%s1089_s4] sm:$0xff] }
  0x14   : > { %v488_v19 = vld [vmem:[%s427_s15] sm:$0xf] }
  0x15   : > { %633 = vmatpush.bf16.msra.mxu2 %v875_v6  ;;  %v878_v20 = vld [vmem:[%s1090_s5] sm:$0xff] }
  0x16   : > { %572 = vmatpush.bf16.msra.mxu1 %v883_v8  ;;  %v912_v28 = vld [vmem:[%s1091_s6] ss:$0 sm:$0xff] }
  0x17   : > { %v913_v31 = vld [vmem:[%s1092_s7] ss:$0 sm:$0xff] }
  0x19   : > { %634 = vmatpush.bf16.msra.mxu2 %v874_v10 }
  0x1a   : > { %573 = vmatpush.bf16.msra.mxu1 %v882_v11 }
  0x1d   : > { %635 = vmatpush.bf16.msra.mxu2 %v873_v12 }
  0x1e   : > { %574 = vmatpush.bf16.msra.mxu1 %v881_v13 }
  0x21   : > { %636 = vmatpush.bf16.msra.mxu2 %v872_v14 }
  0x22   : > { %575 = vmatpush.bf16.msra.mxu1 %v880_v15 }
  0x25   : > { %637 = vmatpush.bf16.msra.mxu2 %v871_v16 }
  0x26   : > { %576 = vmatpush.bf16.msra.mxu1 %v879_v17 }
  0x29   : > { %638 = vmatpush.bf16.msra.mxu2 %v870_v18 }
  0x2a   : > { %577 = vmatpush.bf16.msra.mxu1 %v878_v20 }
  0x2c   : > { %639 = vmatmul.bf16.vlgmr.msra.gmra.mxu2 %v488_v19 }
  0x83   : > { %v485_v21 = vpop.permute.xlu0 %484 }
  0x90   : > { %v471_v22 = vpop.f32.mrf.mxu0 }
  0x91   : > { %v487_v23 = vmul.f32 %v485_v21, %v471_v22 }
  0x93   : > { %v489_v24 = vpack.c.bf16 %v487_v23, %v487_v23 }
  0x95   : > { %578 = vmatmul.bf16.vlgmr.msra.gmra.mxu1 %v489_v24 }
  0x98   : > { %v473_v25 = vpop.f32.mrf.mxu0 }
  0xaf   : > { %v640_v26 = vpop.f32.mrf.mxu2 }
  0xb7   : > { %v642_v27 = vpop.f32.mrf.mxu2 }
 0x112   : > { %v579_v29 = vpop.f32.mrf.mxu1 }
 0x113   : > { %v641_v30 = vadd.f32 %v640_v26, %v579_v29 }
 0x115   : > { %v648_v32 = vmul.f32 %v912_v28, %v641_v30 }
 0x117   : > { %v653_v33 = vadd.f32 %v913_v31, %v648_v32 }
 0x119   : > { %v654_v34 = vmul.f32 0.2, %v653_v33 }
 0x11a   : > { %v581_v35 = vpop.f32.mrf.mxu1 }
 0x11b   : > { %v655_v36 = vmax.f32 %v653_v33, %v654_v34 }
 0x11d   : > { %v656_v37 = vpack.c.bf16 %v655_v36, %v655_v36 }
 0x11f   : > { %657 = vst [vmem:[%s441_s25] sm:$0xf] %v656_v37 }
 0x120 PF: > { %s18_s29 = sadd.s32 1, %s936_s29   ;;  %s1094_s27 = smov %s932_s28 }
 0x121   : > { %p15_p5 = scmp.ge.s32.totalorder %s18_s29, 4   ;;  %s1095_s28 = smov %s1097_s30 }
 0x123   :  { %17 = sbr.rel (!%p15_p5) target bundleno = 2 (0x2), region = 99 }

// kernel: hgnn_layer_forward.3
= control target key start
LH: loop header
LB: loop body
LE: loop exit
PB: predicated region body
PF: predicated region fallthrough
CT: control target
= control target key end

     0   :  { %13 = vsyncpa [#allocation4], 0  ;;  %s1234_s0 = inlined_call_operand.vmem [shape: bf16[2,8,16], index: 0, kind: input, shape index: {}]   ;;  %s1235_s1 = inlined_call_operand.vmem [shape: bf16[2,8,128], index: 1, kind: input, shape index: {}]   ;;  %s1236_s2 = inlined_call_operand.vmem [shape: f32[2,8,1], index: 2, kind: input, shape index: {}]   ;;  %s1237_s3 = inlined_call_operand.vmem [shape: bf16[2,16,128], index: 3, kind: input, shape index: {}]   ;;  %s1238_s4 = inlined_call_operand.vmem [shape: f32[2,16,1], index: 4, kind: input, shape index: {}]   ;;  %s1239_s5 = inlined_call_operand.vmem [shape: bf16[128,128], index: 5, kind: input, shape index: {}]   ;;  %s1240_s6 = inlined_call_operand.vmem [shape: f32[1,128], index: 6, kind: input, shape index: {}]   ;;  %s1241_s7 = inlined_call_operand.vmem [shape: f32[1,128], index: 7, kind: input, shape index: {}]   ;;  %s1242_s8 = inlined_call_operand.hbm [shape: bf16[2,16,128], index: 8, kind: output, shape index: {}]  }
   0x1   :  { %15 = vsyncpa [#allocation4 + $0x1], 0  ;;  %s1086_s27 = smov 0   ;;  %s1088_s28 = smov 0  }
   0x2   :  { %s1090_s29 = smov 0   ;;  %s1092_s30 = smov 0  }
   0x3   :  { %s1094_s9 = smov 0   ;;  %s1096_s10 = smov 0  }
   0x4 LB: > { %s825_s11 = sadd.s32 4294967295, %s1036_s10   ;;  %s826_s12 = sadd.s32 4294967294, %s1036_s10   ;;  %s1036_s10 = sphi %s1096_s10, %s21_s10   ;;  %s1032_s9 = sphi %s1094_s9, %s1249_s9   ;;  %s1028_s30 = sphi %s1092_s30, %s1248_s30   ;;  %s1024_s29 = sphi %s1090_s29, %s1247_s29   ;;  %s1020_s28 = sphi %s1088_s28, %s1246_s28   ;;  %s1016_s27 = sphi %s1086_s27, %s1245_s27  }
   0x5   : > { %s40_s13 = sadd.s32 1, %s1032_s9  ;;  %s254_s14 = sadd.s32 1, %s1024_s29 }
   0x6   : > { %p42_p0 = scmp.ge.s32.totalorder %s40_s13, 2  ;;  %p264_p1 = scmp.ne.s32.totalorder %s1024_s29, %s1020_s28 }
   0x7   : > { %p265_p2 = scmp.eq.s32.totalorder %s825_s11, 1  ;;  %p270_p3 = scmp.ne.s32.totalorder %s1020_s28, %s1016_s27 }
   0x8   : > { %s1251_s13 = smov (%p42_p0, %s40_s13), 0  ;;  %p271_p5 = scmp.eq.s32.totalorder %s826_s12, 1 }
   0x9   : > { %p1126_p4 = por %p265_p2, %p264_p1  ;;  %s249_s16 = ssub.s32 %s1032_s9, %s1251_s13 }
   0xa   : > { %p829_p6 = scmp.ge.s32.totalorder %s1036_s10, 1  ;;  %p252_p7 = scmp.eq.s32.totalorder %s249_s16, 0 }
   0xb   : > { %p1133_p8 = por %p271_p5, %p270_p3  ;;  %p357_p9 = scmp.lt.s32.totalorder %s1036_s10, 3 }
   0xc   : > { %s1139_s18 = scalar_select %p252_p7, %s1024_s29, %s254_s14  }
   0xd   : > { %p358_p10 = pnand %p829_p6, %p357_p9 }
   0xe   : > { %p428_p11 = scmp.lt.s32.totalorder (!%p358_p10), %s1028_s30, 1  ;;  %s425_s12 = sand.u32 (!%p358_p10), 1, %s1020_s28  }
   0xf   : > { %361 = sbr.rel (%p358_p10) target bundleno = 520 (0x208), region = 52  ;;  %s830_s14 = sshll.u32 (!%p358_p10), %s425_s12, 3 }
  0x10   : > { %s427_s22 = scalar_lea.vmem (!%p358_p10), [#allocation3], %s830_s14  ;;  %s978_s14 = scalar_lea.hbm (!%p358_p10), %s1242_s8, 16 }
  0x14   : > { %v1038_v0 = vmov 0   ;;  %s1143_s19 = scalar_select %p428_p11, %s1028_s30, 1  ;;  %vm513_vm0 = vcmask 1043456   ;;  %v885_v10 = vld [vmem:[%s1239_s5 + $0x38] sm:$0xff]  ;;  %v884_v11 = vld [vmem:[%s1239_s5 + $0x30] sm:$0xff]  ;;  %v883_v13 = vld [vmem:[%s1239_s5 + $0x28] sm:$0xff] }
  0x15   : > { %954 = vset.pattern.permute.xlu0 %v1038_v0  ;;  %955 = vset.pattern.permute.xlu1 %v1038_v0  ;;  %vm509_vm1 = vcmask 64512   ;;  %v882_v15 = vld [vmem:[%s1239_s5 + $0x20] sm:$0xff]  ;;  %v881_v16 = vld [vmem:[%s1239_s5 + $0x18] sm:$0xff]  ;;  %v880_v17 = vld [vmem:[%s1239_s5 + $0x10] sm:$0xff] }
  0x16   : > { %s833_s20 = sshll.u32 %s1143_s19, 3  ;;  %s831_s24 = sshll.u32 %s1143_s19, 2  ;;  %619 = vmatpush.bf16.msra.mxu1 %v885_v10  ;;  %v879_v18 = vld [vmem:[%s1239_s5 + $0x8] sm:$0xff]  ;;  %v878_v19 = vld [vmem:[%s1239_s5] sm:$0xff] }
  0x17   : > { %s451_s23 = scalar_lea.vmem %s1236_s2, %s833_s20  ;;  %s437_s11 = scalar_lea.vmem %s1234_s0, %s831_s24  ;;  %v956_v27 = vld [vmem:[%s1240_s6] ss:$0 sm:$0xff] }
  0x18   : > { %v482_v1 = vld [vmem:[%s451_s23] sm:$0xff]  ;;  %s444_s16 = scalar_lea.vmem %s1235_s1, %s831_s24  ;;  %s877_s21 = sshll.u32 %s1143_s19, 4 }
  0x19   : > { %485 = vperm.xlu0 %954, %v482_v1   ;;  %v491_v2 = vld [vmem:[%s437_s11] sm:$0xf]  ;;  %s470_s25 = scalar_lea.vmem %s1238_s4, %s877_s21  ;;  %s886_s19 = sshll.u32 %s1028_s30, 3 }
  0x1a   : > { %v480_v3 = vld [vmem:[%s444_s16] sm:$0xf]  ;;  %v541_v12 = vld [vmem:[%s470_s25 + $0x8] sm:$0xff]  ;;  %620 = vmatpush.bf16.msra.mxu1 %v884_v11  ;;  %s674_s23 = sshll.u32 %s427_s22, 4  ;;  %s675_s23 = int_to_ptr.vmem [resolvable:$true] %s674_s23 }
  0x1b   : > { %v481_v4 = vunpack.c.l.bf16 %v480_v3  ;;  %v540_v9 = vld [vmem:[%s470_s25] sm:$0xff]  ;;  %s460_s25 = scalar_lea.vmem %s1237_s3, %s833_s20  ;;  %s673_s20 = scalar_lea.hbm %s1242_s8, %s886_s19 }
  0x1c   : > { %544 = vperm.xlu1 %955, %v540_v9   ;;  %v957_v30 = vld [vmem:[%s1241_s7] ss:$0 sm:$0xff]  ;;  %s676_s26 = sshll.u32 %s673_s20, 4  ;;  %s677_s26 = int_to_ptr.hbm [resolvable:$true] %s676_s26 }
  0x1d   : > { %v888_v31 = vld [vmem:[%s460_s25] sm:$0xff]   ;;  %s660_s25 = scalar_lea.sflag [#allocation4], %s425_s12  ;;  %s972_s30 = sshra.s32 %s677_s26, 4  ;;  %s973_s30 = int_to_ptr.hbm [resolvable:$true] %s972_s30 }
  0x1e   : > { %621 = vmatpush.bf16.msra.mxu1 %v883_v13  ;;  %v889_v32 = vunpack.c.l.bf16 %v888_v31  ;;  %v890_v35 = vunpack.c.h.bf16 %v888_v31  ;;  %s974_s11 = scalar_lea.hbm %s973_s30, 8  ;;  %p979_p1 = scmp.lt.s32.totalorder %s973_s30, %s1242_s8 }
  0x1f   : > { %p975_p12 = scmp.ne.s32.totalorder %s973_s30, %s974_s11  ;;  %p980_p2 = scmp.lt.s32.totalorder %s978_s14, %s974_s11 }
  0x21   : > { %p976_p13 = pnand %p975_p12, %p1126_p4  ;;  %p981_p3 = por %p980_p2, %p979_p1 }
  0x22   : > { %622 = vmatpush.bf16.msra.mxu1 %v882_v15 }
  0x23   : > { %p977_p0 = pneg %p976_p13 }
  0x24   : > { %549 = vperm.xlu1 %955, %v541_v12  }
  0x25   : > { %p982_p5 = pnand %p981_p3, %p977_p0 }
  0x26   : > { %623 = vmatpush.bf16.msra.mxu1 %v881_v16 }
  0x2a   : > { %624 = vmatpush.bf16.msra.mxu1 %v880_v17 }
  0x2e   : > { %625 = vmatpush.bf16.msra.mxu1 %v879_v18 }
  0x32   : > { %626 = vmatpush.bf16.msra.mxu1 %v878_v19 }
  0x3b   : > { %493 = vxpose.xlu0.c.b16.start.end [1/1] (short) (narrow) %v491_v2, 16 }
  0x8b   : > { %v486_v5 = vpop.permute.xlu0 %485 }
  0x8c   : > { %v488_v6 = vmul.f32 %v486_v5, %v481_v4 }
  0x8e   : > { %v492_v7 = vpack.c.bf16 %v488_v6, %v488_v6  ;;  %v545_v20 = vpop.permute.xlu1 %544 }
  0x90   : > { %v515_v8 = vsel %vm513_vm0, %v492_v7, 0 }
  0x91   : > { %524 = vmatpush.bf16.msra.mxu0 %v515_v8 }
  0x96   : > { %v550_v22 = vpop.permute.xlu1 %549 }
  0xe7   : > { %v501_v14 = vpop.trf.xlu0 }
  0xe8   : > { %838 = vmatmul.msk.bf16.vlgmr.msra.gmra.mxu0 %vm509_vm1, %v501_v14 }
 0x165   : > { %v526_v21 = vpop.f32.mrf.mxu0 }
 0x166   : > { %v552_v24 = vmul.f32 %v545_v20, %v526_v21 }
 0x16d   : > { %v528_v23 = vpop.f32.mrf.mxu0 }
 0x16e   : > { %v553_v25 = vmul.f32 %v550_v22, %v528_v23 }
 0x170   : > { %v554_v26 = vpack.c.bf16 %v553_v25, %v552_v24 }
 0x172   : > { %627 = vmatmul.bf16.vlgmr.msra.gmra.mxu1 %v554_v26 }
 0x1ef   : > { %v628_v28 = vpop.f32.mrf.mxu1 }
 0x1f0   : > { %v637_v29 = vmul.f32 %v956_v27, %v628_v28 }
 0x1f2   : > { %v643_v33 = vadd.f32 %v957_v30, %v637_v29 }
 0x1f4   : > { %v649_v36 = vadd.f32 %v889_v32, %v643_v33 }
 0x1f6   : > { %v651_v39 = vmul.f32 0.2, %v649_v36 }
 0x1f7   : > { %v630_v34 = vpop.f32.mrf.mxu1 }
 0x1f8   : > { %v638_v37 = vmul.f32 %v956_v27, %v630_v34  ;;  %v653_v42 = vmax.f32 %v649_v36, %v651_v39 }
 0x1fa   : > { %v644_v38 = vadd.f32 %v957_v30, %v638_v37 }
 0x1fc   : > { %v650_v40 = vadd.f32 %v890_v35, %v644_v38 }
 0x1fe   : > { %v652_v41 = vmul.f32 0.2, %v650_v40 }
 0x200   : > { %v654_v43 = vmax.f32 %v650_v40, %v652_v41 }
 0x202   : > { %v894_v44 = vpack.c.bf16 %v654_v43, %v653_v42 }
 0x204   : > { %895 = vst [vmem:[%s427_s22] sm:$0xff] %v894_v44  }
 0x205   : > { %985 = shalt.err (!%p982_p5)
}
 0x206   : > { %s1039_s12 = smov 64   ;;  %s1040_s20 = smov 4  }
 0x207   : > { %896 = dma.vmem_to_hbm [thread:$0]  (%p1126_p4), %s675_s23, 128, %s677_s26, %s660_s25, %s1039_s12, %s1039_s12, %s1040_s20  }
 0x208 PF: > { %p902_p6 = scmp.ge.s32.totalorder %s1036_s10, 2  ;;  %s691_s22 = sand.u32 1, %s1016_s27  }
 0x209   : > { %s692_s24 = scalar_lea.sflag [#allocation4], %s691_s22 }
 0x20a   : > { %p899_p7 = pnand %p902_p6, %p1133_p8 }
 0x20c   : > { %p900_p9 = pneg %p899_p7 }
 0x20e   : > { %1011 = dma.done.wait (%p900_p9), %s692_s24, 128  }
 0x20f   : > { %1013 = vsyncadd (%p900_p9), %s692_s24, 4294967168  ;;  %s21_s10 = sadd.s32 1, %s1036_s10   ;;  %s1245_s27 = smov %s1020_s28 }
 0x210   : > { %p18_p10 = scmp.ge.s32.totalorder %s21_s10, 4   ;;  %s1246_s28 = smov %s1024_s29 }
 0x211   : > { %s1247_s29 = smov %s1139_s18  ;;  %s1248_s30 = smov %s1032_s9 }
 0x212   : > { %s1249_s9 = smov %s1251_s13  ;;  %20 = sbr.rel (!%p18_p10) target bundleno = 4 (0x4), region = 107 }
 0x217   :  { %698 = vsyncpa [#allocation4], 1 }
 0x218   :  { %700 = vsyncpa [#allocation4 + $0x1], 1 }

</bundles_post_ra>
